<compile_context>
chip_gen: v7x
topology: tpu7x:2x2x1
jax: 0.10.0
libtpu: 0.0.40
codegen_flags: <defaults>
</compile_context>

<pallas_src>
import functools

import jax
import jax.numpy as jnp
from jax.experimental import pallas as pl
from jax.experimental.pallas import tpu as pltpu


# ------------------------------ small helpers ------------------------------ #
def _round_up(x, m):
    return ((x + m - 1) // m) * m


def _pad2d(x, rows, cols):
    r, c = x.shape
    return jnp.pad(x, ((0, rows - r), (0, cols - c)))


def _normalized_adjacency(adj):
    """A_norm[dst, src] = in_deg(dst)^-1/2 * adj[dst, src] * out_deg(src)^-1/2."""
    out_deg = jnp.clip(jnp.sum(adj, axis=0), 1.0, None)   # per source node
    in_deg = jnp.clip(jnp.sum(adj, axis=1), 1.0, None)    # per destination node
    norm_src = out_deg ** -0.5
    norm_dst = in_deg ** -0.5
    return (norm_dst[:, None] * adj * norm_src[None, :]).astype(jnp.float32)


# ------------------------- tiled per-layer kernel --------------------------- #
def _gcn_layer_tiled_kernel(a_ref, h_ref, w_ref, b_ref, out_ref, acc_ref,
                            *, apply_relu):
    """grid = (row_tiles, k_tiles).  Aggregate (bf16 MXU, f32 acc) across k,
    then project + bias (+relu) on the last k step."""
    k = pl.program_id(1)

    @pl.when(k == 0)
    def _():
        acc_ref[...] = jnp.zeros_like(acc_ref)

    # A_norm tile (TM, TK) bf16  x  H tile (TK, F_in) bf16  ->  f32 accumulator.
    acc_ref[...] += jnp.dot(a_ref[...], h_ref[...],
                            preferred_element_type=jnp.float32)

    @pl.when(k == pl.num_programs(1) - 1)
    def _():
        rst = jnp.dot(acc_ref[...], w_ref[...],
                      preferred_element_type=jnp.float32)
        rst = rst + b_ref[...]
        if apply_relu:
            rst = jnp.maximum(rst, 0.0)
        out_ref[...] = rst.astype(out_ref.dtype)


def gcn_layer_tiled(a_norm_bf16, h, w, b, *, apply_relu, tile_m=128, tile_k=128):
    """One GCN layer on the padded/normalized graph.  Inputs already padded:
    a_norm_bf16 (Np,Np) bf16, h (Np,Fin_p) f32, w (Fin_p,Fout_p) f32, b (Fout_p,)."""
    n_pad = a_norm_bf16.shape[0]
    f_in_pad = h.shape[1]
    f_out_pad = w.shape[1]

    h_bf16 = h.astype(jnp.bfloat16)
    b2d = b.reshape(1, f_out_pad).astype(jnp.float32)

    grid = (n_pad // tile_m, n_pad // tile_k)
    kernel = functools.partial(_gcn_layer_tiled_kernel, apply_relu=apply_relu)

    cost = pl.CostEstimate(
        flops=2 * n_pad * n_pad * f_in_pad + 2 * n_pad * f_in_pad * f_out_pad,
        transcendentals=0,
        bytes_accessed=(2 * n_pad * n_pad + 2 * n_pad * f_in_pad
                        + 4 * f_in_pad * f_out_pad + 4 * n_pad * f_out_pad),
    )

    return pl.pallas_call(
        kernel,
        out_shape=jax.ShapeDtypeStruct((n_pad, f_out_pad), jnp.float32),
        grid=grid,
        in_specs=[
            pl.BlockSpec((tile_m, tile_k), lambda i, k: (i, k)),       # A_norm tile
            pl.BlockSpec((tile_k, f_in_pad), lambda i, k: (k, 0)),     # H tile
            pl.BlockSpec((f_in_pad, f_out_pad), lambda i, k: (0, 0)),  # W (resident)
            pl.BlockSpec((1, f_out_pad), lambda i, k: (0, 0)),         # bias
        ],
        out_specs=pl.BlockSpec((tile_m, f_out_pad), lambda i, k: (i, 0)),
        scratch_shapes=[pltpu.VMEM((tile_m, f_in_pad), jnp.float32)],
        compiler_params=pltpu.CompilerParams(
            dimension_semantics=("parallel", "arbitrary")),
        cost_estimate=cost,
    )(a_norm_bf16, h_bf16, w, b2d)


# ---------------------- fused two-layer small-graph kernel ------------------ #
def _gcn2_fused_kernel(a_ref, h0_ref, w1_ref, b1_ref, w2_ref, b2_ref,
                       out_ref, h1_ref):
    a = a_ref[...]                                                   # bf16, resident
    # layer 1: aggregate -> project -> +bias -> relu
    agg1 = jnp.dot(a, h0_ref[...], preferred_element_type=jnp.float32)
    h1 = jnp.dot(agg1, w1_ref[...], preferred_element_type=jnp.float32) + b1_ref[...]
    h1_ref[...] = jnp.maximum(h1, 0.0).astype(h1_ref.dtype)          # bf16 scratch
    # layer 2: aggregate -> project -> +bias (no activation)
    agg2 = jnp.dot(a, h1_ref[...], preferred_element_type=jnp.float32)
    out = jnp.dot(agg2, w2_ref[...], preferred_element_type=jnp.float32) + b2_ref[...]
    out_ref[...] = out.astype(out_ref.dtype)


def gcn2_fused(a_norm_bf16, h0, w1, b1, w2, b2):
    n_pad = a_norm_bf16.shape[0]
    f0 = h0.shape[1]
    f1 = w1.shape[1]
    f2 = w2.shape[1]
    h0_bf16 = h0.astype(jnp.bfloat16)

    cost = pl.CostEstimate(
        flops=2 * n_pad * n_pad * (f0 + f1)
        + 2 * n_pad * (f0 * f1 + f1 * f2),
        transcendentals=0,
        bytes_accessed=(2 * n_pad * n_pad + 2 * n_pad * f0
                        + 4 * (f0 * f1 + f1 * f2) + 4 * n_pad * f2),
    )

    return pl.pallas_call(
        _gcn2_fused_kernel,
        out_shape=jax.ShapeDtypeStruct((n_pad, f2), jnp.float32),
        grid=(1,),
        in_specs=[
            pl.BlockSpec((n_pad, n_pad), lambda i: (0, 0)),   # A_norm (resident)
            pl.BlockSpec((n_pad, f0), lambda i: (0, 0)),      # learnfeat
            pl.BlockSpec((f0, f1), lambda i: (0, 0)),         # W1
            pl.BlockSpec((1, f1), lambda i: (0, 0)),          # b1
            pl.BlockSpec((f1, f2), lambda i: (0, 0)),         # W2
            pl.BlockSpec((1, f2), lambda i: (0, 0)),          # b2
        ],
        out_specs=pl.BlockSpec((n_pad, f2), lambda i: (0, 0)),
        scratch_shapes=[pltpu.VMEM((n_pad, f1), jnp.bfloat16)],
        compiler_params=pltpu.CompilerParams(
            dimension_semantics=("arbitrary",)),
        cost_estimate=cost,
    )(a_norm_bf16, h0_bf16, w1, b1.reshape(1, f1), w2, b2.reshape(1, f2))


# --------------------------------- model ------------------------------------ #
def gcn_learnfeat_forward(adj, params, *, force_tiled=False, tile_m=128, tile_k=128):
    """GCN_learnfeat.forward: ignores external `features`, uses learnfeat."""
    n = adj.shape[0]
    f0, f1 = params["w1"].shape
    f2 = params["w2"].shape[1]

    lane = 128
    n_pad = _round_up(n, lane)                        # lane-dense adj + tileable rows
    f0p, f1p, f2p = (_round_up(d, lane) for d in (f0, f1, f2))

    # Norm folded into the adjacency ONCE (shared by both layers), then bf16.
    a_norm = _pad2d(_normalized_adjacency(adj), n_pad, n_pad).astype(jnp.bfloat16)

    h0 = _pad2d(params["learnfeat"].astype(jnp.float32), n_pad, f0p)
    w1 = _pad2d(params["w1"].astype(jnp.float32), f0p, f1p)
    w2 = _pad2d(params["w2"].astype(jnp.float32), f1p, f2p)
    b1 = jnp.pad(params["b1"].astype(jnp.float32), (0, f1p - f1))
    b2 = jnp.pad(params["b2"].astype(jnp.float32), (0, f2p - f2))

    # Fused path only when the whole problem comfortably fits scoped VMEM on
    # every generation (v5e 16 MiB default scoped is the tightest) -> <= 6 MiB.
    fused_bytes = (2 * n_pad * n_pad                      # A_norm bf16
                   + 2 * n_pad * (f0p + f1p)              # h0 + h1 scratch (bf16)
                   + 4 * n_pad * f2p                      # output f32
                   + 4 * (f0p * f1p + f1p * f2p + f1p + f2p))
    use_fused = (not force_tiled) and fused_bytes <= (6 << 20)

    if use_fused:
        out_p = gcn2_fused(a_norm, h0, w1, b1, w2, b2)
    else:
        h1_full = gcn_layer_tiled(a_norm, h0, w1, b1, apply_relu=True,
                                  tile_m=tile_m, tile_k=tile_k)
        out_p = gcn_layer_tiled(a_norm, h1_full, w2, b2, apply_relu=False,
                                tile_m=tile_m, tile_k=tile_k)

    return out_p[:n, :f2]


def gcn_learnfeat_reference(adj, params):
    """Pure-JAX f32 reference matching DGL GraphConv(norm='both')."""
    def layer(a, h, w, b, relu):
        out_deg = jnp.clip(jnp.sum(a, axis=0), 1.0, None)
        in_deg = jnp.clip(jnp.sum(a, axis=1), 1.0, None)
        h = h * (out_deg ** -0.5)[:, None]
        if w.shape[0] > w.shape[1]:
            r = a @ (h @ w)
        else:
            r = (a @ h) @ w
        r = r * (in_deg ** -0.5)[:, None] + b[None, :]
        return jnp.maximum(r, 0.0) if relu else r

    h = params["learnfeat"]
    h = layer(adj, h, params["w1"], params["b1"], True)
    h = layer(adj, h, params["w2"], params["b2"], False)
    return h


# --------------------------- init / example inputs -------------------------- #
def xavier_uniform(key, shape):
    fan_in, fan_out = shape
    bound = (6.0 / (fan_in + fan_out)) ** 0.5
    return jax.random.uniform(key, shape, jnp.float32, -bound, bound)


def init_params(key, num_nodes, feat_dim, hid_size, out_size):
    k_feat, k_w1, k_w2 = jax.random.split(key, 3)
    return {
        "learnfeat": jax.random.normal(k_feat, (num_nodes, feat_dim), jnp.float32),
        "w1": xavier_uniform(k_w1, (feat_dim, hid_size)),
        "b1": jnp.zeros((hid_size,), jnp.float32),
        "w2": xavier_uniform(k_w2, (hid_size, out_size)),
        "b2": jnp.zeros((out_size,), jnp.float32),
    }


def make_graph(num_nodes):
    """Deterministic small graph: self-loops + a directed ring (no 0-in-degree)."""
    eye = jnp.eye(num_nodes, dtype=jnp.float32)
    ring = jnp.roll(eye, 1, axis=0)           # edge (i-1) -> i  => adj[i, i-1] = 1
    return jnp.clip(eye + ring, 0.0, 1.0)     # adj[dst, src]


if __name__ == "__main__":
    # Small shapes consistent with GCN_learnfeat(graph, in_size, hid, out, feat_dim).
    NUM_NODES = 200    # pads to 256 -> tiled grid (2, 2) exercises accumulation
    FEAT_DIM = 16      # layer1: 16 -> 32 (relu)
    HID_SIZE = 32      # layer2: 32 -> 8
    OUT_SIZE = 8

    key = jax.random.PRNGKey(0)
    params = init_params(key, NUM_NODES, FEAT_DIM, HID_SIZE, OUT_SIZE)
    adj = make_graph(NUM_NODES)

    ref = gcn_learnfeat_reference(adj, params)

    # Fused small-graph path (default) and the general tiled path.
    out_fused = jax.block_until_ready(gcn_learnfeat_forward(adj, params))
    out_tiled = jax.block_until_ready(
        gcn_learnfeat_forward(adj, params, force_tiled=True))

    for name, out in (("fused", out_fused), ("tiled", out_tiled)):
        assert out.shape == (NUM_NODES, OUT_SIZE), (name, out.shape)
        assert jnp.all(jnp.isfinite(out)), name
        err = float(jnp.max(jnp.abs(out - ref)))
        assert err < 5e-2, (name, err)   # bf16 adj/H operands, f32 accumulation

    print("KERNEL_OK")
</pallas_src>

<mosaic_0001>
module attributes {stable_mosaic.version = 11 : i64} {
  func.func @_gcn2_fused_kernel(%arg0: i32, %arg1: memref<256x256xbf16, #tpu.memory_space<vmem>>, %arg2: memref<256x128xbf16, #tpu.memory_space<vmem>>, %arg3: memref<128x128xf32, #tpu.memory_space<vmem>>, %arg4: memref<1x128xf32, #tpu.memory_space<vmem>>, %arg5: memref<128x128xf32, #tpu.memory_space<vmem>>, %arg6: memref<1x128xf32, #tpu.memory_space<vmem>>, %arg7: memref<256x128xf32, #tpu.memory_space<vmem>>, %arg8: memref<256x128xbf16, #tpu.memory_space<vmem>>) attributes {dimension_semantics = [#tpu.dimension_semantics<arbitrary>], iteration_bounds = array<i64: 1>, scalar_prefetch = 0 : i64, scratch_operands = 1 : i64, tpu.core_type = #tpu.core_type<tc>, window_params = [{pipeline_mode = #tpu.pipeline_mode<synchronous>, transform_indices = @transform_0, window_bounds = array<i64: 256, 256>}, {pipeline_mode = #tpu.pipeline_mode<synchronous>, transform_indices = @transform_1, window_bounds = array<i64: 256, 128>}, {pipeline_mode = #tpu.pipeline_mode<synchronous>, transform_indices = @transform_2, window_bounds = array<i64: 128, 128>}, {pipeline_mode = #tpu.pipeline_mode<synchronous>, transform_indices = @transform_3, window_bounds = array<i64: 1, 128>}, {pipeline_mode = #tpu.pipeline_mode<synchronous>, transform_indices = @transform_4, window_bounds = array<i64: 128, 128>}, {pipeline_mode = #tpu.pipeline_mode<synchronous>, transform_indices = @transform_5, window_bounds = array<i64: 1, 128>}, {pipeline_mode = #tpu.pipeline_mode<synchronous>, transform_indices = @transform_6, window_bounds = array<i64: 256, 128>}]} {
    %c0 = arith.constant 0 : index
    %c0_0 = arith.constant 0 : index
    %0 = vector.load %arg1[%c0, %c0_0] : memref<256x256xbf16, #tpu.memory_space<vmem>>, vector<256x256xbf16>
    %c0_1 = arith.constant 0 : index
    %c0_2 = arith.constant 0 : index
    %1 = vector.load %arg2[%c0_1, %c0_2] : memref<256x128xbf16, #tpu.memory_space<vmem>>, vector<256x128xbf16>
    %cst = arith.constant dense<0.000000e+00> : vector<256x128xf32>
    %2 = tpu.matmul %0, %1, %cst {dimension_numbers = #tpu.dot_dimension_numbers<[1], [0], [0], [1], [0, 0, 1, 1], [], []>} : vector<256x256xbf16>, vector<256x128xbf16>, vector<256x128xf32> -> vector<256x128xf32>
    %c0_3 = arith.constant 0 : index
    %c0_4 = arith.constant 0 : index
    %3 = vector.load %arg3[%c0_3, %c0_4] : memref<128x128xf32, #tpu.memory_space<vmem>>, vector<128x128xf32>
    %cst_5 = arith.constant dense<0.000000e+00> : vector<256x128xf32>
    %4 = tpu.matmul %2, %3, %cst_5 {dimension_numbers = #tpu.dot_dimension_numbers<[1], [0], [0], [1], [0, 0, 1, 1], [], []>} : vector<256x128xf32>, vector<128x128xf32>, vector<256x128xf32> -> vector<256x128xf32>
    %c0_6 = arith.constant 0 : index
    %c0_7 = arith.constant 0 : index
    %5 = vector.load %arg4[%c0_6, %c0_7] : memref<1x128xf32, #tpu.memory_space<vmem>>, vector<1x128xf32>
    %6 = vector.broadcast %5 : vector<1x128xf32> to vector<256x128xf32>
    %7 = arith.addf %4, %6 : vector<256x128xf32>
    %cst_8 = arith.constant 0.000000e+00 : f32
    %8 = vector.broadcast %cst_8 : f32 to vector<256x128xf32>
    %9 = arith.maximumf %7, %8 : vector<256x128xf32>
    %10 = arith.truncf %9 : vector<256x128xf32> to vector<256x128xbf16>
    %c0_9 = arith.constant 0 : index
    %c0_10 = arith.constant 0 : index
    %11 = vector.load %arg8[%c0_9, %c0_10] : memref<256x128xbf16, #tpu.memory_space<vmem>>, vector<256x128xbf16>
    tpu.vector_store %arg8[%c0_9, %c0_10], %10 {strides = array<i32>} : memref<256x128xbf16, #tpu.memory_space<vmem>>, vector<256x128xbf16>,
    %c0_11 = arith.constant 0 : index
    %c0_12 = arith.constant 0 : index
    %12 = vector.load %arg8[%c0_11, %c0_12] : memref<256x128xbf16, #tpu.memory_space<vmem>>, vector<256x128xbf16>
    %cst_13 = arith.constant dense<0.000000e+00> : vector<256x128xf32>
    %13 = tpu.matmul %0, %12, %cst_13 {dimension_numbers = #tpu.dot_dimension_numbers<[1], [0], [0], [1], [0, 0, 1, 1], [], []>} : vector<256x256xbf16>, vector<256x128xbf16>, vector<256x128xf32> -> vector<256x128xf32>
    %c0_14 = arith.constant 0 : index
    %c0_15 = arith.constant 0 : index
    %14 = vector.load %arg5[%c0_14, %c0_15] : memref<128x128xf32, #tpu.memory_space<vmem>>, vector<128x128xf32>
    %cst_16 = arith.constant dense<0.000000e+00> : vector<256x128xf32>
    %15 = tpu.matmul %13, %14, %cst_16 {dimension_numbers = #tpu.dot_dimension_numbers<[1], [0], [0], [1], [0, 0, 1, 1], [], []>} : vector<256x128xf32>, vector<128x128xf32>, vector<256x128xf32> -> vector<256x128xf32>
    %c0_17 = arith.constant 0 : index
    %c0_18 = arith.constant 0 : index
    %16 = vector.load %arg6[%c0_17, %c0_18] : memref<1x128xf32, #tpu.memory_space<vmem>>, vector<1x128xf32>
    %17 = vector.broadcast %16 : vector<1x128xf32> to vector<256x128xf32>
    %18 = arith.addf %15, %17 : vector<256x128xf32>
    %c0_19 = arith.constant 0 : index
    %c0_20 = arith.constant 0 : index
    %19 = vector.load %arg7[%c0_19, %c0_20] : memref<256x128xf32, #tpu.memory_space<vmem>>, vector<256x128xf32>
    tpu.vector_store %arg7[%c0_19, %c0_20], %18 {strides = array<i32>} : memref<256x128xf32, #tpu.memory_space<vmem>>, vector<256x128xf32>,
    return
  }
  func.func @transform_0(%arg0: i32) -> (i32, i32) {
    %c0_i32 = arith.constant 0 : i32
    %c0_i32_0 = arith.constant 0 : i32
    %c0_i32_1 = arith.constant 0 : i32
    return %c0_i32, %c0_i32_0 : i32, i32
  }
  func.func @transform_1(%arg0: i32) -> (i32, i32) {
    %c0_i32 = arith.constant 0 : i32
    %c0_i32_0 = arith.constant 0 : i32
    %c0_i32_1 = arith.constant 0 : i32
    return %c0_i32, %c0_i32_0 : i32, i32
  }
  func.func @transform_2(%arg0: i32) -> (i32, i32) {
    %c0_i32 = arith.constant 0 : i32
    %c0_i32_0 = arith.constant 0 : i32
    %c0_i32_1 = arith.constant 0 : i32
    return %c0_i32, %c0_i32_0 : i32, i32
  }
  func.func @transform_3(%arg0: i32) -> (i32, i32) {
    %c0_i32 = arith.constant 0 : i32
    %c0_i32_0 = arith.constant 0 : i32
    %c0_i32_1 = arith.constant 0 : i32
    return %c0_i32, %c0_i32_0 : i32, i32
  }
  func.func @transform_4(%arg0: i32) -> (i32, i32) {
    %c0_i32 = arith.constant 0 : i32
    %c0_i32_0 = arith.constant 0 : i32
    %c0_i32_1 = arith.constant 0 : i32
    return %c0_i32, %c0_i32_0 : i32, i32
  }
  func.func @transform_5(%arg0: i32) -> (i32, i32) {
    %c0_i32 = arith.constant 0 : i32
    %c0_i32_0 = arith.constant 0 : i32
    %c0_i32_1 = arith.constant 0 : i32
    return %c0_i32, %c0_i32_0 : i32, i32
  }
  func.func @transform_6(%arg0: i32) -> (i32, i32) {
    %c0_i32 = arith.constant 0 : i32
    %c0_i32_0 = arith.constant 0 : i32
    %c0_i32_1 = arith.constant 0 : i32
    return %c0_i32, %c0_i32_0 : i32, i32
  }
}

</mosaic_0001>

<bundles_post_ra>
// kernel: tpu_custom_call.1
= control target key start
LH: loop header
LB: loop body
LE: loop exit
PB: predicated region body
PF: predicated region fallthrough
CT: control target
= control target key end

     0   :  { %11 = vsyncpa [#allocation4], 0  ;;  %s2477_s0 = inlined_call_operand.hbm [shape: bf16[256,256], index: 0, kind: input, shape index: {}]   ;;  %s2478_s1 = inlined_call_operand.hbm [shape: bf16[256,128], index: 1, kind: input, shape index: {}]   ;;  %s2479_s2 = inlined_call_operand.hbm [shape: f32[128,128], index: 2, kind: input, shape index: {}]   ;;  %s2480_s3 = inlined_call_operand.vmem [shape: f32[1,128], index: 3, kind: input, shape index: {}]   ;;  %s2481_s4 = inlined_call_operand.hbm [shape: f32[128,128], index: 4, kind: input, shape index: {}]   ;;  %s2482_s5 = inlined_call_operand.vmem [shape: f32[1,128], index: 5, kind: input, shape index: {}]   ;;  %s2483_s6 = inlined_call_operand.hbm [shape: f32[256,128], index: 6, kind: output, shape index: {}]  }
   0x1   :  { %12 = vsyncpa [#allocation7], 0 }
   0x2   :  { %13 = vsyncpa [#allocation10], 0 }
   0x3   :  { %14 = vsyncpa [#allocation5], 0  ;;  %s2134_s21 = smov [#allocation6]   ;;  %s2016_s25 = scalar_lea.hbm %s2478_s1, 2048 }
   0x4   :  { %s32_s22 = sshll.u32 %s2134_s21, 4  ;;  %p2017_p0 = scmp.ne.s32.totalorder %s2478_s1, %s2016_s25  ;;  %s33_s22 = int_to_ptr.vmem [resolvable:$true] %s32_s22 }
   0x5   :  { %p2020_p1 = scmp.lt.u32.totalorder %s2016_s25, %s2478_s1 }
   0x7   :  { %p2022_p2 = pnand %p2020_p1, %p2017_p0 }
   0x9   :  { %2025 = shalt.err (!%p2022_p2)
}
   0xa   :  { %s2026_s30 = scalar_lea.vmem %s33_s22, 2048  ;;  %p2031_p4 = scmp.lt.s32.totalorder %s33_s22, %s33_s22 }
   0xb   :  { %p2027_p3 = scmp.ne.s32.totalorder %s33_s22, %s2026_s30  ;;  %p2032_p5 = scmp.lt.s32.totalorder %s2026_s30, %s2026_s30 }
   0xd   :  { %p2033_p6 = por %p2032_p5, %p2031_p4 }
   0xf   :  { %p2034_p7 = pnand %p2033_p6, %p2027_p3 }
  0x11   :  { %2037 = shalt.err (!%p2034_p7)
}
  0x12   :  { %s2135_s7 = smov 64   ;;  %s2136_s8 = smov 4  }
  0x13   :  { %38 = dma.hbm_to_vmem [thread:$0]  %s2478_s1, 2048, %s33_s22, [#allocation7], %s2135_s7, %s2135_s7, %s2136_s8  }
  0x14   :  { %s2137_s11 = smov [#allocation3]   ;;  %s2038_s15 = scalar_lea.hbm %s2477_s0, 4096 }
  0x15   :  { %s20_s12 = sshll.u32 %s2137_s11, 4  ;;  %p2039_p8 = scmp.ne.s32.totalorder %s2477_s0, %s2038_s15  ;;  %s21_s12 = int_to_ptr.vmem [resolvable:$true] %s20_s12 }
  0x16   :  { %p2042_p9 = scmp.lt.u32.totalorder %s2038_s15, %s2477_s0 }
  0x18   :  { %p2044_p10 = pnand %p2042_p9, %p2039_p8 }
  0x1a   :  { %2047 = shalt.err (!%p2044_p10)
}
  0x1b   :  { %s2048_s20 = scalar_lea.vmem %s21_s12, 4096  ;;  %p2053_p12 = scmp.lt.s32.totalorder %s21_s12, %s21_s12 }
  0x1c   :  { %p2049_p11 = scmp.ne.s32.totalorder %s21_s12, %s2048_s20  ;;  %p2054_p13 = scmp.lt.s32.totalorder %s2048_s20, %s2048_s20 }
  0x1e   :  { %p2055_p0 = por %p2054_p13, %p2053_p12 }
  0x20   :  { %p2056_p1 = pnand %p2055_p0, %p2049_p11 }
  0x22   :  { %2059 = shalt.err (!%p2056_p1)
}
  0x23   :  { %s2138_s1 = smov 128   ;;  %s2139_s21 = smov 8  }
  0x24   :  { %26 = dma.hbm_to_vmem [thread:$0]  %s2477_s0, 4096, %s21_s12, [#allocation4], %s2138_s1, %s2138_s1, %s2139_s21  }
  0x25   :  { %s2140_s24 = smov [#allocation8]   ;;  %s2141_s26 = smov [#allocation9]  }
  0x26   :  { %s44_s25 = sshll.u32 %s2140_s24, 4  ;;  %s58_s27 = sshll.u32 %s2141_s26, 4  ;;  %s45_s25 = int_to_ptr.vmem [resolvable:$true] %s44_s25  ;;  %s2205_s27 = int_to_ptr.vmem [resolvable:$true] %s58_s27 }
  0x27   :  { %s2060_s30 = scalar_lea.hbm %s2479_s2, 2048 }
  0x28   :  { %p2061_p2 = scmp.ne.s32.totalorder %s2479_s2, %s2060_s30  ;;  %p2064_p3 = scmp.lt.u32.totalorder %s2060_s30, %s2479_s2 }
  0x2a   :  { %p2066_p4 = pnand %p2064_p3, %p2061_p2 }
  0x2c   :  { %2069 = shalt.err (!%p2066_p4)
}
  0x2d   :  { %s2070_s0 = scalar_lea.vmem %s45_s25, 2048  ;;  %p2075_p6 = scmp.lt.s32.totalorder %s45_s25, %s45_s25 }
  0x2e   :  { %p2071_p5 = scmp.ne.s32.totalorder %s45_s25, %s2070_s0  ;;  %p2076_p7 = scmp.lt.s32.totalorder %s2070_s0, %s2070_s0 }
  0x30   :  { %p2077_p8 = por %p2076_p7, %p2075_p6 }
  0x32   :  { %p2078_p9 = pnand %p2077_p8, %p2071_p5 }
  0x34   :  { %2081 = shalt.err (!%p2078_p9)
}
  0x35   :  { %50 = dma.hbm_to_vmem [thread:$0]  %s2479_s2, 2048, %s45_s25, [#allocation7], %s2138_s1, %s2138_s1, %s2139_s21  }
  0x36   :  { %s2082_s15 = scalar_lea.hbm %s2481_s4, 2048 }
  0x37   :  { %p2083_p10 = scmp.ne.s32.totalorder %s2481_s4, %s2082_s15  ;;  %p2086_p11 = scmp.lt.u32.totalorder %s2082_s15, %s2481_s4 }
  0x39   :  { %p2088_p12 = pnand %p2086_p11, %p2083_p10 }
  0x3b   :  { %2091 = shalt.err (!%p2088_p12)
}
  0x3c   :  { %s2092_s20 = scalar_lea.vmem %s2205_s27, 2048  ;;  %p2097_p0 = scmp.lt.s32.totalorder %s2205_s27, %s2205_s27 }
  0x3d   :  { %p2093_p13 = scmp.ne.s32.totalorder %s2205_s27, %s2092_s20  ;;  %p2098_p1 = scmp.lt.s32.totalorder %s2092_s20, %s2092_s20 }
  0x3f   :  { %p2099_p2 = por %p2098_p1, %p2097_p0 }
  0x41   :  { %p2100_p3 = pnand %p2099_p2, %p2093_p13 }
  0x43   :  { %2103 = shalt.err (!%p2100_p3)
}
  0x44   :  { %64 = dma.hbm_to_vmem [thread:$0]  %s2481_s4, 2048, %s2205_s27, [#allocation10], %s2138_s1, %s2138_s1, %s2139_s21  }
  0x45   :  { %2126 = dma.done.wait [#allocation4], 4096  }
  0x46   :  { %2127 = vsyncadd [#allocation4], 4294963200 }
  0x47   :  { %2128 = dma.done.wait [#allocation7], 4096  }
  0x48   :  { %2129 = vsyncadd [#allocation7], 4294963200 }
  0x49   :  { %2130 = dma.done.wait [#allocation10], 2048  }
  0x4a   :  { %2131 = vsyncadd [#allocation10], 4294965248  ;;  %v1952_v0 = vld [vmem:[#allocation6 + $0x40] sm:$0xff]   ;;  %v1954_v2 = vld [vmem:[#allocation6 + $0x48] sm:$0xff]  }
  0x4b   :  { %v1953_v1 = vld [vmem:[#allocation6] sm:$0xff]   ;;  %1399 = vmatprep.subr.bf16.mxu0 %v1952_v0  ;;  %v1955_v3 = vld [vmem:[#allocation6 + $0x8] sm:$0xff]   ;;  %v1956_v4 = vld [vmem:[#allocation6 + $0x50] sm:$0xff]  }
  0x4c   :  { %1400 = vmatpush3.bf16.msra.mxu0 %v1953_v1  ;;  %v1957_v5 = vld [vmem:[#allocation6 + $0x10] sm:$0xff]   ;;  %v1958_v6 = vld [vmem:[#allocation6 + $0x58] sm:$0xff]   ;;  %v1960_v8 = vld [vmem:[#allocation6 + $0x60] sm:$0xff]  }
  0x4d   :  { %1401 = vmatprep.subr.bf16.mxu0 %v1954_v2  ;;  %v1959_v7 = vld [vmem:[#allocation6 + $0x18] sm:$0xff]   ;;  %v1961_v9 = vld [vmem:[#allocation6 + $0x20] sm:$0xff]   ;;  %v1962_v10 = vld [vmem:[#allocation6 + $0x68] sm:$0xff]  }
  0x4e   :  { %v2242_v11 = vld [vmem:[#allocation3 + $0x4] ss:$8 sps:$4 sm:$0xff]   ;;  %v1964_v13 = vld [vmem:[#allocation6 + $0x70] sm:$0xff]   ;;  %v1966_v15 = vld [vmem:[#allocation6 + $0x78] sm:$0xff]  }
  0x4f   :  { %v1963_v12 = vld [vmem:[#allocation6 + $0x28] sm:$0xff]   ;;  %432 = vmatprep.mubr.bf16.mxu0 %v2242_v11  ;;  %v1965_v14 = vld [vmem:[#allocation6 + $0x30] sm:$0xff]   ;;  %v1967_v16 = vld [vmem:[#allocation6 + $0x38] sm:$0xff]  }
  0x50   :  { %1402 = vmatpush3.bf16.msra.mxu0 %v1955_v3  ;;  %v2245_v17 = vld [vmem:[#allocation3] ss:$8 sps:$4 sm:$0xff]   ;;  %v2247_v18 = vld [vmem:[#allocation3 + $0x14] ss:$8 sps:$4 sm:$0xff]   ;;  %v2251_v21 = vld [vmem:[#allocation3 + $0x10] ss:$8 sps:$4 sm:$0xff]  }
  0x51   :  { %1403 = vmatprep.subr.bf16.mxu0 %v1956_v4  ;;  %v561_v19 = vld [vmem:[#allocation8] sm:$0xff]  ;;  %v562_v20 = vld [vmem:[#allocation8 + $0x8] sm:$0xff]  ;;  %v563_v23 = vld [vmem:[#allocation8 + $0x10] sm:$0xff] }
  0x52   :  { %v1879_v22 = vpack.c.bf16 %v562_v20, %v561_v19  ;;  %v564_v24 = vld [vmem:[#allocation8 + $0x18] sm:$0xff]  ;;  %v2253_v25 = vld [vmem:[#allocation3 + $0x24] ss:$8 sps:$4 sm:$0xff]   ;;  %v567_v30 = vld [vmem:[#allocation8 + $0x30] sm:$0xff] }
  0x53   :  { %v1883_v26 = vpack.c.bf16 %v564_v24, %v563_v23  ;;  %v565_v27 = vld [vmem:[#allocation8 + $0x20] sm:$0xff]  ;;  %v566_v28 = vld [vmem:[#allocation8 + $0x28] sm:$0xff]  ;;  %v568_v31 = vld [vmem:[#allocation8 + $0x38] sm:$0xff] }
  0x54   :  { %1404 = vmatpush3.bf16.msra.mxu0 %v1957_v5  ;;  %1880 = vmatprep.subr.bf16.mxu1 %v1879_v22  ;;  %v1887_v29 = vpack.c.bf16 %v566_v28, %v565_v27  ;;  %v2257_v32 = vld [vmem:[#allocation3 + $0x20] ss:$8 sps:$4 sm:$0xff]   ;;  %v1891_v33 = vpack.c.bf16 %v568_v31, %v567_v30  ;;  %v2259_v34 = vld [vmem:[#allocation3 + $0x34] ss:$8 sps:$4 sm:$0xff]   ;;  %v2263_v40 = vld [vmem:[#allocation3 + $0x30] ss:$8 sps:$4 sm:$0xff]  }
  0x55   :  { %1405 = vmatprep.subr.bf16.mxu0 %v1958_v6  ;;  %1882 = vmatpush3.bf16.msra.mxu1 %v1879_v22  ;;  %v569_v35 = vld [vmem:[#allocation8 + $0x40] sm:$0xff]  ;;  %v570_v36 = vld [vmem:[#allocation8 + $0x48] sm:$0xff]  ;;  %v571_v38 = vld [vmem:[#allocation8 + $0x50] sm:$0xff] }
  0x56   :  { %1884 = vmatprep.subr.bf16.mxu1 %v1883_v26  ;;  %v1895_v37 = vpack.c.bf16 %v570_v36, %v569_v35  ;;  %v572_v39 = vld [vmem:[#allocation8 + $0x58] sm:$0xff]  ;;  %v2265_v42 = vld [vmem:[#allocation3 + $0x44] ss:$8 sps:$4 sm:$0xff]   ;;  %v2269_v46 = vld [vmem:[#allocation3 + $0x40] ss:$8 sps:$4 sm:$0xff]  }
  0x57   :  { %v1899_v41 = vpack.c.bf16 %v572_v39, %v571_v38  ;;  %v573_v43 = vld [vmem:[#allocation8 + $0x60] sm:$0xff]  ;;  %v574_v44 = vld [vmem:[#allocation8 + $0x68] sm:$0xff]  ;;  %v2271_v47 = vld [vmem:[#allocation3 + $0x54] ss:$8 sps:$4 sm:$0xff]  }
  0x58   :  { %1406 = vmatpush3.bf16.msra.mxu0 %v1959_v7  ;;  %v1903_v45 = vpack.c.bf16 %v574_v44, %v573_v43  ;;  %v2275_v48 = vld [vmem:[#allocation3 + $0x50] ss:$8 sps:$4 sm:$0xff]   ;;  %v2277_v49 = vld [vmem:[#allocation3 + $0x64] ss:$8 sps:$4 sm:$0xff]   ;;  %v2281_v50 = vld [vmem:[#allocation3 + $0x60] ss:$8 sps:$4 sm:$0xff]  }
  0x59   :  { %1407 = vmatprep.subr.bf16.mxu0 %v1960_v8  ;;  %1886 = vmatpush3.bf16.msra.mxu1 %v1883_v26  ;;  %v2283_v51 = vld [vmem:[#allocation3 + $0x74] ss:$8 sps:$4 sm:$0xff]   ;;  %v2287_v52 = vld [vmem:[#allocation3 + $0x70] ss:$8 sps:$4 sm:$0xff]   ;;  %v2289_v53 = vld [vmem:[#allocation3 + $0x84] ss:$8 sps:$4 sm:$0xff]  }
  0x5a   :  { %1888 = vmatprep.subr.bf16.mxu1 %v1887_v29  ;;  %v2293_v54 = vld [vmem:[#allocation3 + $0x80] ss:$8 sps:$4 sm:$0xff]   ;;  %v2295_v55 = vld [vmem:[#allocation3 + $0x94] ss:$8 sps:$4 sm:$0xff]   ;;  %v2299_v56 = vld [vmem:[#allocation3 + $0x90] ss:$8 sps:$4 sm:$0xff]  }
  0x5b   :  { %v2301_v57 = vld [vmem:[#allocation3 + $0xa4] ss:$8 sps:$4 sm:$0xff]   ;;  %v2305_v58 = vld [vmem:[#allocation3 + $0xa0] ss:$8 sps:$4 sm:$0xff]   ;;  %v2307_v59 = vld [vmem:[#allocation3 + $0xb4] ss:$8 sps:$4 sm:$0xff]  }
  0x5c   :  { %1408 = vmatpush3.bf16.msra.mxu0 %v1961_v9  ;;  %v575_v60 = vld [vmem:[#allocation8 + $0x70] sm:$0xff]  ;;  %v576_v61 = vld [vmem:[#allocation8 + $0x78] sm:$0xff]  ;;  %v2313_v0 = vld [vmem:[#allocation3 + $0xc4] ss:$8 sps:$4 sm:$0xff]  }
  0x5d   :  { %1409 = vmatprep.subr.bf16.mxu0 %v1962_v10  ;;  %1890 = vmatpush3.bf16.msra.mxu1 %v1887_v29  ;;  %v1907_v62 = vpack.c.bf16 %v576_v61, %v575_v60  ;;  %v2311_v63 = vld [vmem:[#allocation3 + $0xb0] ss:$8 sps:$4 sm:$0xff]   ;;  %v2317_v1 = vld [vmem:[#allocation3 + $0xc0] ss:$8 sps:$4 sm:$0xff]   ;;  %v2319_v2 = vld [vmem:[#allocation3 + $0xd4] ss:$8 sps:$4 sm:$0xff]  }
  0x5e   :  { %1892 = vmatprep.subr.bf16.mxu1 %v1891_v33  ;;  %v2323_v3 = vld [vmem:[#allocation3 + $0xd0] ss:$8 sps:$4 sm:$0xff]   ;;  %v2325_v4 = vld [vmem:[#allocation3 + $0xe4] ss:$8 sps:$4 sm:$0xff]   ;;  %v2329_v5 = vld [vmem:[#allocation3 + $0xe0] ss:$8 sps:$4 sm:$0xff]  }
  0x5f   :  { %v2331_v6 = vld [vmem:[#allocation3 + $0xf4] ss:$8 sps:$4 sm:$0xff]   ;;  %v2335_v7 = vld [vmem:[#allocation3 + $0xf0] ss:$8 sps:$4 sm:$0xff]  }
  0x60   :  { %1410 = vmatpush3.bf16.msra.mxu0 %v1963_v12 }
  0x61   :  { %1411 = vmatprep.subr.bf16.mxu0 %v1964_v13  ;;  %1894 = vmatpush3.bf16.msra.mxu1 %v1891_v33 }
  0x62   :  { %1896 = vmatprep.subr.bf16.mxu1 %v1895_v37 }
  0x64   :  { %1412 = vmatpush3.bf16.msra.mxu0 %v1965_v14 }
  0x65   :  { %1413 = vmatprep.subr.bf16.mxu0 %v1966_v15  ;;  %1898 = vmatpush3.bf16.msra.mxu1 %v1895_v37 }
  0x66   :  { %1900 = vmatprep.subr.bf16.mxu1 %v1899_v41 }
  0x68   :  { %1414 = vmatpush3.bf16.msra.mxu0 %v1967_v16 }
  0x69   :  { %1902 = vmatpush3.bf16.msra.mxu1 %v1899_v41 }
  0x6a   :  { %1904 = vmatprep.subr.bf16.mxu1 %v1903_v45 }
  0x6b   :  { %433 = vmatmul.mubr.bf16.vlgmr.msra.gmra.mrb[0].mxu0 %v2245_v17 }
  0x6c   :  { %440 = vmatprep.mubr.bf16.mxu0 %v2247_v18 }
  0x6d   :  { %1906 = vmatpush3.bf16.msra.mxu1 %v1903_v45 }
  0x6e   :  { %1908 = vmatprep.subr.bf16.mxu1 %v1907_v62 }
  0x71   :  { %1910 = vmatpush3.bf16.msra.mxu1 %v1907_v62 }
  0x73   :  { %441 = vmatmul.mubr.bf16.gmra.mrb[4].mxu0 %v2251_v21 }
  0x74   :  { %448 = vmatprep.mubr.bf16.mxu0 %v2253_v25 }
  0x7b   :  { %449 = vmatmul.mubr.bf16.gmra.mrb[8].mxu0 %v2257_v32 }
  0x7c   :  { %456 = vmatprep.mubr.bf16.mxu0 %v2259_v34 }
  0x83   :  { %457 = vmatmul.mubr.bf16.gmra.mrb[12].mxu0 %v2263_v40 }
  0x84   :  { %464 = vmatprep.mubr.bf16.mxu0 %v2265_v42 }
  0x8b   :  { %465 = vmatmul.mubr.bf16.gmra.mrb[16].mxu0 %v2269_v46 }
  0x8c   :  { %472 = vmatprep.mubr.bf16.mxu0 %v2271_v47 }
  0x93   :  { %473 = vmatmul.mubr.bf16.gmra.mrb[20].mxu0 %v2275_v48 }
  0x94   :  { %480 = vmatprep.mubr.bf16.mxu0 %v2277_v49 }
  0x9b   :  { %481 = vmatmul.mubr.bf16.gmra.mrb[24].mxu0 %v2281_v50 }
  0x9c   :  { %488 = vmatprep.mubr.bf16.mxu0 %v2283_v51 }
  0xa3   :  { %489 = vmatmul.mubr.bf16.gmra.mrb[28].mxu0 %v2287_v52 }
  0xa4   :  { %496 = vmatprep.mubr.bf16.mxu0 %v2289_v53 }
  0xab   :  { %497 = vmatmul.mubr.bf16.gmra.mrb[32].mxu0 %v2293_v54 }
  0xac   :  { %504 = vmatprep.mubr.bf16.mxu0 %v2295_v55 }
  0xb3   :  { %505 = vmatmul.mubr.bf16.gmra.mrb[36].mxu0 %v2299_v56 }
  0xb4   :  { %512 = vmatprep.mubr.bf16.mxu0 %v2301_v57 }
  0xbb   :  { %513 = vmatmul.mubr.bf16.gmra.mrb[40].mxu0 %v2305_v58 }
  0xbc   :  { %520 = vmatprep.mubr.bf16.mxu0 %v2307_v59 }
  0xc3   :  { %521 = vmatmul.mubr.bf16.gmra.mrb[44].mxu0 %v2311_v63 }
  0xc4   :  { %528 = vmatprep.mubr.bf16.mxu0 %v2313_v0 }
  0xcb   :  { %529 = vmatmul.mubr.bf16.gmra.mrb[48].mxu0 %v2317_v1 }
  0xcc   :  { %536 = vmatprep.mubr.bf16.mxu0 %v2319_v2 }
  0xd3   :  { %537 = vmatmul.mubr.bf16.gmra.mrb[52].mxu0 %v2323_v3 }
  0xd4   :  { %544 = vmatprep.mubr.bf16.mxu0 %v2325_v4 }
  0xdb   :  { %545 = vmatmul.mubr.bf16.gmra.mrb[56].mxu0 %v2329_v5 }
  0xdc   :  { %552 = vmatprep.mubr.bf16.mxu0 %v2331_v6 }
  0xe3   :  { %553 = vmatmul.mubr.bf16.gmra.mrb[60].mxu0 %v2335_v7 }
 0x13e   :  { %v1415_v8 = vpop.f32.mrb[0].mxu0 }
 0x13f   :  { %v1416_v9 = vpop.f32.mrb[1].mxu0 }
 0x140   :  { %v1418_v10 = vpop.f32.mrb[2].mxu0  ;;  %v1417_v12 = vadd.f32 %v1416_v9, %v1415_v8 }
 0x141   :  { %v1419_v13 = vpop.f32.mrb[3].mxu0 }
 0x142   :  { %v1420_v14 = vadd.f32 %v1419_v13, %v1418_v10  ;;  %1751 = vmatprep.mubr.f32.mxu1 %v1417_v12 }
 0x144   :  { %1752 = vmatmul.mubr.f32.vlgmr.msra.gmra.mrb[0].mxu1 %v1420_v14 }
 0x146   :  { %v1421_v15 = vpop.f32.mrb[4].mxu0 }
 0x147   :  { %v1422_v16 = vpop.f32.mrb[5].mxu0 }
 0x148   :  { %v1423_v19 = vadd.f32 %v1422_v16, %v1421_v15  ;;  %v1424_v20 = vpop.f32.mrb[6].mxu0 }
 0x149   :  { %v1425_v22 = vpop.f32.mrb[7].mxu0 }
 0x14a   :  { %v1426_v23 = vadd.f32 %v1425_v22, %v1424_v20  ;;  %1754 = vmatprep.mubr.f32.mxu1 %v1423_v19 }
 0x14c   :  { %1755 = vmatmul.mubr.f32.gmra.mrb[2].mxu1 %v1426_v23 }
 0x14e   :  { %v1427_v24 = vpop.f32.mrb[8].mxu0 }
 0x14f   :  { %v1428_v26 = vpop.f32.mrb[9].mxu0 }
 0x150   :  { %v1429_v27 = vadd.f32 %v1428_v26, %v1427_v24  ;;  %v1430_v28 = vpop.f32.mrb[10].mxu0 }
 0x151   :  { %v1431_v29 = vpop.f32.mrb[11].mxu0 }
 0x152   :  { %v1432_v30 = vadd.f32 %v1431_v29, %v1430_v28  ;;  %1757 = vmatprep.mubr.f32.mxu1 %v1429_v27 }
 0x154   :  { %1758 = vmatmul.mubr.f32.gmra.mrb[4].mxu1 %v1432_v30 }
 0x156   :  { %v1433_v31 = vpop.f32.mrb[12].mxu0 }
 0x157   :  { %v1434_v33 = vpop.f32.mrb[13].mxu0 }
 0x158   :  { %v1435_v35 = vadd.f32 %v1434_v33, %v1433_v31  ;;  %v1436_v36 = vpop.f32.mrb[14].mxu0 }
 0x159   :  { %v1437_v37 = vpop.f32.mrb[15].mxu0 }
 0x15a   :  { %v1438_v38 = vadd.f32 %v1437_v37, %v1436_v36  ;;  %1760 = vmatprep.mubr.f32.mxu1 %v1435_v35 }
 0x15c   :  { %1761 = vmatmul.mubr.f32.gmra.mrb[6].mxu1 %v1438_v38 }
 0x15e   :  { %v1439_v39 = vpop.f32.mrb[16].mxu0 }
 0x15f   :  { %v1440_v41 = vpop.f32.mrb[17].mxu0 }
 0x160   :  { %v1441_v43 = vadd.f32 %v1440_v41, %v1439_v39  ;;  %v1442_v44 = vpop.f32.mrb[18].mxu0 }
 0x161   :  { %v1443_v45 = vpop.f32.mrb[19].mxu0 }
 0x162   :  { %v1444_v60 = vadd.f32 %v1443_v45, %v1442_v44  ;;  %1763 = vmatprep.mubr.f32.mxu1 %v1441_v43 }
 0x164   :  { %1764 = vmatmul.mubr.f32.gmra.mrb[8].mxu1 %v1444_v60 }
 0x166   :  { %v1445_v61 = vpop.f32.mrb[20].mxu0 }
 0x167   :  { %v1446_v62 = vpop.f32.mrb[21].mxu0 }
 0x168   :  { %v1447_v8 = vadd.f32 %v1446_v62, %v1445_v61  ;;  %v1448_v9 = vpop.f32.mrb[22].mxu0 }
 0x169   :  { %v1449_v10 = vpop.f32.mrb[23].mxu0 }
 0x16a   :  { %v1450_v12 = vadd.f32 %v1449_v10, %v1448_v9  ;;  %1766 = vmatprep.mubr.f32.mxu1 %v1447_v8 }
 0x16c   :  { %1767 = vmatmul.mubr.f32.gmra.mrb[10].mxu1 %v1450_v12 }
 0x16e   :  { %v1451_v13 = vpop.f32.mrb[24].mxu0 }
 0x16f   :  { %v1452_v14 = vpop.f32.mrb[25].mxu0 }
 0x170   :  { %v1453_v15 = vadd.f32 %v1452_v14, %v1451_v13  ;;  %v1454_v16 = vpop.f32.mrb[26].mxu0 }
 0x171   :  { %v1455_v19 = vpop.f32.mrb[27].mxu0 }
 0x172   :  { %v1456_v20 = vadd.f32 %v1455_v19, %v1454_v16  ;;  %1769 = vmatprep.mubr.f32.mxu1 %v1453_v15 }
 0x174   :  { %1770 = vmatmul.mubr.f32.gmra.mrb[12].mxu1 %v1456_v20 }
 0x176   :  { %v1457_v22 = vpop.f32.mrb[28].mxu0 }
 0x177   :  { %v1458_v23 = vpop.f32.mrb[29].mxu0 }
 0x178   :  { %v1459_v24 = vadd.f32 %v1458_v23, %v1457_v22  ;;  %v1460_v26 = vpop.f32.mrb[30].mxu0 }
 0x179   :  { %v1461_v27 = vpop.f32.mrb[31].mxu0 }
 0x17a   :  { %v1462_v28 = vadd.f32 %v1461_v27, %v1460_v26  ;;  %1772 = vmatprep.mubr.f32.mxu1 %v1459_v24 }
 0x17c   :  { %1773 = vmatmul.mubr.f32.gmra.mrb[14].mxu1 %v1462_v28 }
 0x17e   :  { %v1463_v29 = vpop.f32.mrb[32].mxu0 }
 0x17f   :  { %v1464_v30 = vpop.f32.mrb[33].mxu0 }
 0x180   :  { %v1465_v31 = vadd.f32 %v1464_v30, %v1463_v29  ;;  %v1466_v33 = vpop.f32.mrb[34].mxu0 }
 0x181   :  { %v1467_v35 = vpop.f32.mrb[35].mxu0 }
 0x182   :  { %v1468_v36 = vadd.f32 %v1467_v35, %v1466_v33  ;;  %1775 = vmatprep.mubr.f32.mxu1 %v1465_v31 }
 0x184   :  { %1776 = vmatmul.mubr.f32.gmra.mrb[16].mxu1 %v1468_v36 }
 0x186   :  { %v1469_v37 = vpop.f32.mrb[36].mxu0 }
 0x187   :  { %v1470_v38 = vpop.f32.mrb[37].mxu0 }
 0x188   :  { %v1471_v39 = vadd.f32 %v1470_v38, %v1469_v37  ;;  %v1472_v41 = vpop.f32.mrb[38].mxu0 }
 0x189   :  { %v1473_v43 = vpop.f32.mrb[39].mxu0 }
 0x18a   :  { %v1474_v44 = vadd.f32 %v1473_v43, %v1472_v41  ;;  %1778 = vmatprep.mubr.f32.mxu1 %v1471_v39 }
 0x18c   :  { %1779 = vmatmul.mubr.f32.gmra.mrb[18].mxu1 %v1474_v44 }
 0x18e   :  { %v1475_v45 = vpop.f32.mrb[40].mxu0 }
 0x18f   :  { %v1476_v60 = vpop.f32.mrb[41].mxu0 }
 0x190   :  { %v1477_v61 = vadd.f32 %v1476_v60, %v1475_v45  ;;  %v1478_v62 = vpop.f32.mrb[42].mxu0 }
 0x191   :  { %v1479_v8 = vpop.f32.mrb[43].mxu0 }
 0x192   :  { %v1480_v9 = vadd.f32 %v1479_v8, %v1478_v62  ;;  %1781 = vmatprep.mubr.f32.mxu1 %v1477_v61  ;;  %v2342_v8 = vld [vmem:[%s2480_s3] ss:$0 sm:$0xff] }
 0x194   :  { %1782 = vmatmul.mubr.f32.gmra.mrb[20].mxu1 %v1480_v9 }
 0x196   :  { %v1481_v10 = vpop.f32.mrb[44].mxu0 }
 0x197   :  { %v1482_v12 = vpop.f32.mrb[45].mxu0 }
 0x198   :  { %v1483_v13 = vadd.f32 %v1482_v12, %v1481_v10  ;;  %v1484_v14 = vpop.f32.mrb[46].mxu0 }
 0x199   :  { %v1485_v15 = vpop.f32.mrb[47].mxu0 }
 0x19a   :  { %v1486_v16 = vadd.f32 %v1485_v15, %v1484_v14  ;;  %1784 = vmatprep.mubr.f32.mxu1 %v1483_v13 }
 0x19c   :  { %1785 = vmatmul.mubr.f32.gmra.mrb[22].mxu1 %v1486_v16 }
 0x19e   :  { %v1487_v19 = vpop.f32.mrb[48].mxu0 }
 0x19f   :  { %v1488_v20 = vpop.f32.mrb[49].mxu0 }
 0x1a0   :  { %v1489_v22 = vadd.f32 %v1488_v20, %v1487_v19  ;;  %v1490_v23 = vpop.f32.mrb[50].mxu0 }
 0x1a1   :  { %v1491_v24 = vpop.f32.mrb[51].mxu0 }
 0x1a2   :  { %v1492_v26 = vadd.f32 %v1491_v24, %v1490_v23  ;;  %1787 = vmatprep.mubr.f32.mxu1 %v1489_v22 }
 0x1a4   :  { %1788 = vmatmul.mubr.f32.gmra.mrb[24].mxu1 %v1492_v26 }
 0x1a6   :  { %v1493_v27 = vpop.f32.mrb[52].mxu0 }
 0x1a7   :  { %v1494_v28 = vpop.f32.mrb[53].mxu0 }
 0x1a8   :  { %v1495_v29 = vadd.f32 %v1494_v28, %v1493_v27  ;;  %v1496_v30 = vpop.f32.mrb[54].mxu0 }
 0x1a9   :  { %v1497_v31 = vpop.f32.mrb[55].mxu0 }
 0x1aa   :  { %v1498_v33 = vadd.f32 %v1497_v31, %v1496_v30  ;;  %1790 = vmatprep.mubr.f32.mxu1 %v1495_v29 }
 0x1ac   :  { %1791 = vmatmul.mubr.f32.gmra.mrb[26].mxu1 %v1498_v33 }
 0x1ae   :  { %v1499_v35 = vpop.f32.mrb[56].mxu0 }
 0x1af   :  { %v1500_v36 = vpop.f32.mrb[57].mxu0 }
 0x1b0   :  { %v1501_v37 = vadd.f32 %v1500_v36, %v1499_v35  ;;  %v1502_v38 = vpop.f32.mrb[58].mxu0 }
 0x1b1   :  { %v1503_v39 = vpop.f32.mrb[59].mxu0 }
 0x1b2   :  { %v1504_v41 = vadd.f32 %v1503_v39, %v1502_v38  ;;  %1793 = vmatprep.mubr.f32.mxu1 %v1501_v37 }
 0x1b4   :  { %1794 = vmatmul.mubr.f32.gmra.mrb[28].mxu1 %v1504_v41 }
 0x1b6   :  { %v1505_v43 = vpop.f32.mrb[60].mxu0 }
 0x1b7   :  { %v1506_v44 = vpop.f32.mrb[61].mxu0 }
 0x1b8   :  { %v1507_v45 = vadd.f32 %v1506_v44, %v1505_v43  ;;  %v1508_v60 = vpop.f32.mrb[62].mxu0 }
 0x1b9   :  { %v1509_v61 = vpop.f32.mrb[63].mxu0 }
 0x1ba   :  { %v1510_v62 = vadd.f32 %v1509_v61, %v1508_v60  ;;  %1796 = vmatprep.mubr.f32.mxu1 %v1507_v45 }
 0x1bc   :  { %1797 = vmatmul.mubr.f32.gmra.mrb[30].mxu1 %v1510_v62 }
 0x1bd   :  { %921 = vmatprep.mubr.bf16.mxu1 %v2242_v11 }
 0x217   :  { %v1753_v9 = vpop.f32.mrb[0].mxu1 }
 0x218   :  { %v656_v10 = vadd.f32 %v1753_v9, %v2342_v8  ;;  %v650_v12 = vpop.f32.mrb[1].mxu1 }
 0x219   :  { %v651_v13 = vadd.f32 %v2342_v8, %v650_v12 }
 0x21a   :  { %v810_v14 = vmax.f32 %v656_v10, 0.0 }
 0x21b   :  { %v809_v15 = vmax.f32 %v651_v13, 0.0 }
 0x21d   :  { %v841_v16 = vpack.c.bf16 %v810_v14, %v809_v15 }
 0x21f   :  { %v1756_v19 = vpop.f32.mrb[2].mxu1 }
 0x220   :  { %v666_v20 = vadd.f32 %v1756_v19, %v2342_v8  ;;  %v660_v22 = vpop.f32.mrb[3].mxu1 }
 0x221   :  { %v661_v11 = vadd.f32 %v2342_v8, %v660_v22 }
 0x222   :  { %v812_v23 = vmax.f32 %v666_v20, 0.0 }
 0x223   :  { %v811_v24 = vmax.f32 %v661_v11, 0.0 }
 0x225   :  { %v842_v26 = vpack.c.bf16 %v812_v23, %v811_v24 }
 0x227   :  { %v1759_v27 = vpop.f32.mrb[4].mxu1 }
 0x228   :  { %v676_v28 = vadd.f32 %v1759_v27, %v2342_v8  ;;  %v670_v29 = vpop.f32.mrb[5].mxu1 }
 0x229   :  { %v671_v30 = vadd.f32 %v2342_v8, %v670_v29 }
 0x22a   :  { %v814_v31 = vmax.f32 %v676_v28, 0.0 }
 0x22b   :  { %v813_v33 = vmax.f32 %v671_v30, 0.0 }
 0x22d   :  { %v2350_v35 = vpack.c.bf16 %v814_v31, %v813_v33 }
 0x22f   :  { %v1762_v36 = vpop.f32.mrb[6].mxu1 }
 0x230   :  { %v686_v37 = vadd.f32 %v1762_v36, %v2342_v8  ;;  %v680_v38 = vpop.f32.mrb[7].mxu1 }
 0x231   :  { %v681_v39 = vadd.f32 %v2342_v8, %v680_v38 }
 0x232   :  { %v816_v41 = vmax.f32 %v686_v37, 0.0 }
 0x233   :  { %v815_v43 = vmax.f32 %v681_v39, 0.0 }
 0x235   :  { %v2354_v44 = vpack.c.bf16 %v816_v41, %v815_v43 }
 0x237   :  { %v1765_v45 = vpop.f32.mrb[8].mxu1 }
 0x238   :  { %v696_v60 = vadd.f32 %v1765_v45, %v2342_v8  ;;  %v690_v61 = vpop.f32.mrb[9].mxu1 }
 0x239   :  { %v691_v62 = vadd.f32 %v2342_v8, %v690_v61 }
 0x23a   :  { %v818_v9 = vmax.f32 %v696_v60, 0.0 }
 0x23b   :  { %v817_v10 = vmax.f32 %v691_v62, 0.0 }
 0x23d   :  { %v2358_v12 = vpack.c.bf16 %v818_v9, %v817_v10 }
 0x23f   :  { %v1768_v13 = vpop.f32.mrb[10].mxu1 }
 0x240   :  { %v706_v14 = vadd.f32 %v1768_v13, %v2342_v8  ;;  %v700_v15 = vpop.f32.mrb[11].mxu1 }
 0x241   :  { %v701_v19 = vadd.f32 %v2342_v8, %v700_v15 }
 0x242   :  { %v820_v20 = vmax.f32 %v706_v14, 0.0 }
 0x243   :  { %v819_v22 = vmax.f32 %v701_v19, 0.0 }
 0x245   :  { %v2362_v11 = vpack.c.bf16 %v820_v20, %v819_v22 }
 0x247   :  { %v1771_v23 = vpop.f32.mrb[12].mxu1 }
 0x248   :  { %v716_v24 = vadd.f32 %v1771_v23, %v2342_v8  ;;  %v710_v27 = vpop.f32.mrb[13].mxu1 }
 0x249   :  { %v711_v28 = vadd.f32 %v2342_v8, %v710_v27 }
 0x24a   :  { %v822_v29 = vmax.f32 %v716_v24, 0.0 }
 0x24b   :  { %v821_v30 = vmax.f32 %v711_v28, 0.0 }
 0x24d   :  { %v2366_v31 = vpack.c.bf16 %v822_v29, %v821_v30 }
 0x24f   :  { %v1774_v33 = vpop.f32.mrb[14].mxu1 }
 0x250   :  { %v726_v36 = vadd.f32 %v1774_v33, %v2342_v8  ;;  %v720_v37 = vpop.f32.mrb[15].mxu1 }
 0x251   :  { %v721_v38 = vadd.f32 %v2342_v8, %v720_v37 }
 0x252   :  { %v824_v39 = vmax.f32 %v726_v36, 0.0 }
 0x253   :  { %v823_v41 = vmax.f32 %v721_v38, 0.0 }
 0x255   :  { %v2370_v43 = vpack.c.bf16 %v824_v39, %v823_v41 }
 0x257   :  { %v1777_v45 = vpop.f32.mrb[16].mxu1 }
 0x258   :  { %v736_v60 = vadd.f32 %v1777_v45, %v2342_v8  ;;  %v730_v61 = vpop.f32.mrb[17].mxu1 }
 0x259   :  { %v731_v62 = vadd.f32 %v2342_v8, %v730_v61 }
 0x25a   :  { %v826_v9 = vmax.f32 %v736_v60, 0.0 }
 0x25b   :  { %v825_v10 = vmax.f32 %v731_v62, 0.0 }
 0x25d   :  { %v849_v13 = vpack.c.bf16 %v826_v9, %v825_v10 }
 0x25f   :  { %v1780_v14 = vpop.f32.mrb[18].mxu1  ;;  %1559 = vmatprep.subr.bf16.mxu1 %v849_v13 }
 0x260   :  { %v746_v15 = vadd.f32 %v1780_v14, %v2342_v8  ;;  %v740_v19 = vpop.f32.mrb[19].mxu1  ;;  %1560 = vmatpush3.bf16.msra.mxu1 %v841_v16 }
 0x261   :  { %v741_v20 = vadd.f32 %v2342_v8, %v740_v19 }
 0x262   :  { %v828_v22 = vmax.f32 %v746_v15, 0.0 }
 0x263   :  { %v827_v23 = vmax.f32 %v741_v20, 0.0 }
 0x265   :  { %v850_v24 = vpack.c.bf16 %v828_v22, %v827_v23 }
 0x267   :  { %v1783_v27 = vpop.f32.mrb[20].mxu1  ;;  %1561 = vmatprep.subr.bf16.mxu1 %v850_v24 }
 0x268   :  { %v756_v28 = vadd.f32 %v1783_v27, %v2342_v8  ;;  %v750_v29 = vpop.f32.mrb[21].mxu1  ;;  %1562 = vmatpush3.bf16.msra.mxu1 %v842_v26 }
 0x269   :  { %v751_v30 = vadd.f32 %v2342_v8, %v750_v29 }
 0x26a   :  { %v830_v33 = vmax.f32 %v756_v28, 0.0 }
 0x26b   :  { %v829_v36 = vmax.f32 %v751_v30, 0.0 }
 0x26d   :  { %v851_v37 = vpack.c.bf16 %v830_v33, %v829_v36 }
 0x26f   :  { %v1786_v38 = vpop.f32.mrb[22].mxu1  ;;  %1563 = vmatprep.subr.bf16.mxu1 %v851_v37 }
 0x270   :  { %v766_v16 = vadd.f32 %v1786_v38, %v2342_v8  ;;  %v760_v39 = vpop.f32.mrb[23].mxu1  ;;  %1564 = vmatpush3.bf16.msra.mxu1 %v2350_v35 }
 0x271   :  { %v761_v41 = vadd.f32 %v2342_v8, %v760_v39 }
 0x272   :  { %v832_v45 = vmax.f32 %v766_v16, 0.0 }
 0x273   :  { %v831_v60 = vmax.f32 %v761_v41, 0.0 }
 0x275   :  { %v852_v61 = vpack.c.bf16 %v832_v45, %v831_v60  ;;  %v1050_v60 = vld [vmem:[#allocation9] sm:$0xff] }
 0x277   :  { %v1789_v62 = vpop.f32.mrb[24].mxu1  ;;  %1565 = vmatprep.subr.bf16.mxu1 %v852_v61  ;;  %v1051_v61 = vld [vmem:[#allocation9 + $0x8] sm:$0xff] }
 0x278   :  { %v776_v26 = vadd.f32 %v1789_v62, %v2342_v8  ;;  %v770_v9 = vpop.f32.mrb[25].mxu1  ;;  %1566 = vmatpush3.bf16.msra.mxu1 %v2354_v44  ;;  %v1052_v62 = vld [vmem:[#allocation9 + $0x10] sm:$0xff] }
 0x279   :  { %v771_v10 = vadd.f32 %v2342_v8, %v770_v9 }
 0x27a   :  { %v834_v13 = vmax.f32 %v776_v26, 0.0  ;;  %v1053_v26 = vld [vmem:[#allocation9 + $0x18] sm:$0xff] }
 0x27b   :  { %v833_v14 = vmax.f32 %v771_v10, 0.0  ;;  %v1915_v10 = vpack.c.bf16 %v1053_v26, %v1052_v62 }
 0x27d   :  { %v853_v15 = vpack.c.bf16 %v834_v13, %v833_v14  ;;  %v1054_v13 = vld [vmem:[#allocation9 + $0x20] sm:$0xff]  ;;  %v1055_v14 = vld [vmem:[#allocation9 + $0x28] sm:$0xff] }
 0x27f   :  { %v1792_v19 = vpop.f32.mrb[26].mxu1  ;;  %1567 = vmatprep.subr.bf16.mxu1 %v853_v15  ;;  %v1056_v15 = vld [vmem:[#allocation9 + $0x30] sm:$0xff] }
 0x280   :  { %v786_v35 = vadd.f32 %v1792_v19, %v2342_v8  ;;  %v780_v20 = vpop.f32.mrb[27].mxu1  ;;  %1568 = vmatpush3.bf16.msra.mxu1 %v2358_v12 }
 0x281   :  { %v781_v22 = vadd.f32 %v2342_v8, %v780_v20  ;;  %v1059_v20 = vld [vmem:[#allocation9 + $0x48] sm:$0xff] }
 0x282   :  { %v836_v23 = vmax.f32 %v786_v35, 0.0  ;;  %v1058_v35 = vld [vmem:[#allocation9 + $0x40] sm:$0xff] }
 0x283   :  { %v835_v24 = vmax.f32 %v781_v22, 0.0  ;;  %v1927_v22 = vpack.c.bf16 %v1059_v20, %v1058_v35 }
 0x285   :  { %v854_v27 = vpack.c.bf16 %v836_v23, %v835_v24  ;;  %v1060_v23 = vld [vmem:[#allocation9 + $0x50] sm:$0xff]  ;;  %v1061_v24 = vld [vmem:[#allocation9 + $0x58] sm:$0xff] }
 0x287   :  { %v1795_v28 = vpop.f32.mrb[28].mxu1  ;;  %1569 = vmatprep.subr.bf16.mxu1 %v854_v27  ;;  %v1063_v27 = vld [vmem:[#allocation9 + $0x68] sm:$0xff] }
 0x288   :  { %v796_v44 = vadd.f32 %v1795_v28, %v2342_v8  ;;  %v790_v29 = vpop.f32.mrb[29].mxu1  ;;  %1570 = vmatpush3.bf16.msra.mxu1 %v2362_v11  ;;  %v1911_v11 = vpack.c.bf16 %v1051_v61, %v1050_v60 }
 0x289   :  { %v791_v30 = vadd.f32 %v2342_v8, %v790_v29 }
 0x28a   :  { %v838_v33 = vmax.f32 %v796_v44, 0.0  ;;  %1912 = vmatprep.subr.bf16.mxu0 %v1911_v11 }
 0x28b   :  { %v837_v36 = vmax.f32 %v791_v30, 0.0  ;;  %1914 = vmatpush3.bf16.msra.mxu0 %v1911_v11 }
 0x28c   :  { %1916 = vmatprep.subr.bf16.mxu0 %v1915_v10 }
 0x28d   :  { %v855_v37 = vpack.c.bf16 %v838_v33, %v837_v36 }
 0x28f   :  { %v1798_v38 = vpop.f32.mrb[30].mxu1  ;;  %1571 = vmatprep.subr.bf16.mxu1 %v855_v37  ;;  %1918 = vmatpush3.bf16.msra.mxu0 %v1915_v10 }
 0x290   :  { %v806_v12 = vadd.f32 %v1798_v38, %v2342_v8  ;;  %v800_v16 = vpop.f32.mrb[31].mxu1  ;;  %1572 = vmatpush3.bf16.msra.mxu1 %v2366_v31  ;;  %v1919_v31 = vpack.c.bf16 %v1055_v14, %v1054_v13 }
 0x291   :  { %v801_v39 = vadd.f32 %v2342_v8, %v800_v16  ;;  %v1057_v8 = vld [vmem:[#allocation9 + $0x38] sm:$0xff] }
 0x292   :  { %v840_v41 = vmax.f32 %v806_v12, 0.0  ;;  %1920 = vmatprep.subr.bf16.mxu0 %v1919_v31  ;;  %v1923_v19 = vpack.c.bf16 %v1057_v8, %v1056_v15 }
 0x293   :  { %v839_v45 = vmax.f32 %v801_v39, 0.0  ;;  %1922 = vmatpush3.bf16.msra.mxu0 %v1919_v31 }
 0x294   :  { %1924 = vmatprep.subr.bf16.mxu0 %v1923_v19 }
 0x295   :  { %v856_v9 = vpack.c.bf16 %v840_v41, %v839_v45 }
 0x297   :  { %1573 = vmatprep.subr.bf16.mxu1 %v856_v9  ;;  %1926 = vmatpush3.bf16.msra.mxu0 %v1923_v19 }
 0x298   :  { %1574 = vmatpush3.bf16.msra.mxu1 %v2370_v43  ;;  %1928 = vmatprep.subr.bf16.mxu0 %v1927_v22  ;;  %v1931_v43 = vpack.c.bf16 %v1061_v24, %v1060_v23 }
 0x29b   :  { %922 = vmatmul.mubr.bf16.vlgmr.msra.gmra.mrb[32].mxu1 %v2245_v17  ;;  %v1062_v17 = vld [vmem:[#allocation9 + $0x60] sm:$0xff]  ;;  %1930 = vmatpush3.bf16.msra.mxu0 %v1927_v22 }
 0x29c   :  { %929 = vmatprep.mubr.bf16.mxu1 %v2247_v18  ;;  %1932 = vmatprep.subr.bf16.mxu0 %v1931_v43  ;;  %v1935_v18 = vpack.c.bf16 %v1063_v27, %v1062_v17 }
 0x29f   :  { %1934 = vmatpush3.bf16.msra.mxu0 %v1931_v43 }
 0x2a0   :  { %1936 = vmatprep.subr.bf16.mxu0 %v1935_v18 }
 0x2a3   :  { %930 = vmatmul.mubr.bf16.gmra.mrb[36].mxu1 %v2251_v21  ;;  %1938 = vmatpush3.bf16.msra.mxu0 %v1935_v18  ;;  %v1064_v21 = vld [vmem:[#allocation9 + $0x70] sm:$0xff] }
 0x2a4   :  { %937 = vmatprep.mubr.bf16.mxu1 %v2253_v25  ;;  %v1065_v25 = vld [vmem:[#allocation9 + $0x78] sm:$0xff] }
 0x2ab   :  { %938 = vmatmul.mubr.bf16.gmra.mrb[40].mxu1 %v2257_v32  ;;  %v1939_v32 = vpack.c.bf16 %v1065_v25, %v1064_v21 }
 0x2ac   :  { %945 = vmatprep.mubr.bf16.mxu1 %v2259_v34 }
 0x2ad   :  { %1940 = vmatprep.subr.bf16.mxu0 %v1939_v32 }
 0x2ae   :  { %1942 = vmatpush3.bf16.msra.mxu0 %v1939_v32 }
 0x2b3   :  { %946 = vmatmul.mubr.bf16.gmra.mrb[44].mxu1 %v2263_v40 }
 0x2b4   :  { %953 = vmatprep.mubr.bf16.mxu1 %v2265_v42 }
 0x2bb   :  { %954 = vmatmul.mubr.bf16.gmra.mrb[48].mxu1 %v2269_v46 }
 0x2bc   :  { %961 = vmatprep.mubr.bf16.mxu1 %v2271_v47 }
 0x2c3   :  { %962 = vmatmul.mubr.bf16.gmra.mrb[52].mxu1 %v2275_v48 }
 0x2c4   :  { %969 = vmatprep.mubr.bf16.mxu1 %v2277_v49 }
 0x2cb   :  { %970 = vmatmul.mubr.bf16.gmra.mrb[56].mxu1 %v2281_v50 }
 0x2cc   :  { %977 = vmatprep.mubr.bf16.mxu1 %v2283_v51 }
 0x2d3   :  { %978 = vmatmul.mubr.bf16.gmra.mrb[60].mxu1 %v2287_v52 }
 0x2d4   :  { %985 = vmatprep.mubr.bf16.mxu1 %v2289_v53 }
 0x2db   :  { %986 = vmatmul.mubr.bf16.gmra.mrb[64].mxu1 %v2293_v54 }
 0x2dc   :  { %993 = vmatprep.mubr.bf16.mxu1 %v2295_v55 }
 0x2e3   :  { %994 = vmatmul.mubr.bf16.gmra.mrb[68].mxu1 %v2299_v56 }
 0x2e4   :  { %1001 = vmatprep.mubr.bf16.mxu1 %v2301_v57 }
 0x2eb   :  { %1002 = vmatmul.mubr.bf16.gmra.mrb[72].mxu1 %v2305_v58 }
 0x2ec   :  { %1009 = vmatprep.mubr.bf16.mxu1 %v2307_v59 }
 0x2f3   :  { %1010 = vmatmul.mubr.bf16.gmra.mrb[76].mxu1 %v2311_v63 }
 0x2f4   :  { %1017 = vmatprep.mubr.bf16.mxu1 %v2313_v0 }
 0x2fb   :  { %1018 = vmatmul.mubr.bf16.gmra.mrb[80].mxu1 %v2317_v1 }
 0x2fc   :  { %1025 = vmatprep.mubr.bf16.mxu1 %v2319_v2 }
 0x303   :  { %1026 = vmatmul.mubr.bf16.gmra.mrb[84].mxu1 %v2323_v3 }
 0x304   :  { %1033 = vmatprep.mubr.bf16.mxu1 %v2325_v4 }
 0x30b   :  { %1034 = vmatmul.mubr.bf16.gmra.mrb[88].mxu1 %v2329_v5 }
 0x30c   :  { %1041 = vmatprep.mubr.bf16.mxu1 %v2331_v6 }
 0x313   :  { %1042 = vmatmul.mubr.bf16.gmra.mrb[92].mxu1 %v2335_v7 }
 0x36e   :  { %v1575_v34 = vpop.f32.mrb[32].mxu1 }
 0x36f   :  { %v1576_v40 = vpop.f32.mrb[33].mxu1 }
 0x370   :  { %v1577_v42 = vadd.f32 %v1576_v40, %v1575_v34  ;;  %v1578_v46 = vpop.f32.mrb[34].mxu1 }
 0x371   :  { %v1579_v47 = vpop.f32.mrb[35].mxu1 }
 0x372   :  { %v1580_v48 = vadd.f32 %v1579_v47, %v1578_v46  ;;  %1831 = vmatprep.mubr.f32.mxu0 %v1577_v42 }
 0x374   :  { %1832 = vmatmul.mubr.f32.vlgmr.msra.gmra.mrb[64].mxu0 %v1580_v48 }
 0x376   :  { %v1581_v49 = vpop.f32.mrb[36].mxu1 }
 0x377   :  { %v1582_v50 = vpop.f32.mrb[37].mxu1 }
 0x378   :  { %v1583_v51 = vadd.f32 %v1582_v50, %v1581_v49  ;;  %v1584_v52 = vpop.f32.mrb[38].mxu1 }
 0x379   :  { %v1585_v53 = vpop.f32.mrb[39].mxu1 }
 0x37a   :  { %v1586_v54 = vadd.f32 %v1585_v53, %v1584_v52  ;;  %1834 = vmatprep.mubr.f32.mxu0 %v1583_v51 }
 0x37c   :  { %1835 = vmatmul.mubr.f32.gmra.mrb[66].mxu0 %v1586_v54 }
 0x37e   :  { %v1587_v55 = vpop.f32.mrb[40].mxu1 }
 0x37f   :  { %v1588_v56 = vpop.f32.mrb[41].mxu1 }
 0x380   :  { %v1589_v57 = vadd.f32 %v1588_v56, %v1587_v55  ;;  %v1590_v58 = vpop.f32.mrb[42].mxu1 }
 0x381   :  { %v1591_v59 = vpop.f32.mrb[43].mxu1 }
 0x382   :  { %v1592_v63 = vadd.f32 %v1591_v59, %v1590_v58  ;;  %1837 = vmatprep.mubr.f32.mxu0 %v1589_v57 }
 0x384   :  { %1838 = vmatmul.mubr.f32.gmra.mrb[68].mxu0 %v1592_v63 }
 0x386   :  { %v1593_v0 = vpop.f32.mrb[44].mxu1 }
 0x387   :  { %v1594_v1 = vpop.f32.mrb[45].mxu1 }
 0x388   :  { %v1595_v2 = vadd.f32 %v1594_v1, %v1593_v0  ;;  %v1596_v3 = vpop.f32.mrb[46].mxu1 }
 0x389   :  { %v1597_v4 = vpop.f32.mrb[47].mxu1 }
 0x38a   :  { %v1598_v5 = vadd.f32 %v1597_v4, %v1596_v3  ;;  %1840 = vmatprep.mubr.f32.mxu0 %v1595_v2 }
 0x38c   :  { %1841 = vmatmul.mubr.f32.gmra.mrb[70].mxu0 %v1598_v5 }
 0x38e   :  { %v1599_v6 = vpop.f32.mrb[48].mxu1 }
 0x38f   :  { %v1600_v7 = vpop.f32.mrb[49].mxu1 }
 0x390   :  { %v1601_v28 = vadd.f32 %v1600_v7, %v1599_v6  ;;  %v1602_v44 = vpop.f32.mrb[50].mxu1 }
 0x391   :  { %v1603_v29 = vpop.f32.mrb[51].mxu1 }
 0x392   :  { %v1604_v30 = vadd.f32 %v1603_v29, %v1602_v44  ;;  %1843 = vmatprep.mubr.f32.mxu0 %v1601_v28 }
 0x394   :  { %1844 = vmatmul.mubr.f32.gmra.mrb[72].mxu0 %v1604_v30 }
 0x396   :  { %v1605_v33 = vpop.f32.mrb[52].mxu1 }
 0x397   :  { %v1606_v36 = vpop.f32.mrb[53].mxu1 }
 0x398   :  { %v1607_v37 = vadd.f32 %v1606_v36, %v1605_v33  ;;  %v1608_v38 = vpop.f32.mrb[54].mxu1 }
 0x399   :  { %v1609_v12 = vpop.f32.mrb[55].mxu1 }
 0x39a   :  { %v1610_v16 = vadd.f32 %v1609_v12, %v1608_v38  ;;  %1846 = vmatprep.mubr.f32.mxu0 %v1607_v37  ;;  %v2428_v37 = vld [vmem:[%s2482_s5] ss:$0 sm:$0xff]  ;;  %s2142_s5 = smov [#allocation11]  }
 0x39b   :  { %s1335_s25 = sshll.u32 %s2142_s5, 4  ;;  %s1336_s25 = int_to_ptr.vmem [resolvable:$true] %s1335_s25 }
 0x39c   :  { %1847 = vmatmul.mubr.f32.gmra.mrb[74].mxu0 %v1610_v16  ;;  %s2104_s26 = scalar_lea.vmem %s1336_s25, 4096  ;;  %p2109_p5 = scmp.lt.s32.totalorder %s1336_s25, %s1336_s25 }
 0x39d   :  { %p2105_p4 = scmp.ne.s32.totalorder %s1336_s25, %s2104_s26  ;;  %p2110_p6 = scmp.lt.s32.totalorder %s2104_s26, %s2104_s26 }
 0x39e   :  { %v1611_v39 = vpop.f32.mrb[56].mxu1 }
 0x39f   :  { %v1612_v41 = vpop.f32.mrb[57].mxu1  ;;  %p2111_p7 = por %p2110_p6, %p2109_p5 }
 0x3a0   :  { %v1613_v45 = vadd.f32 %v1612_v41, %v1611_v39  ;;  %v1614_v60 = vpop.f32.mrb[58].mxu1 }
 0x3a1   :  { %v1615_v61 = vpop.f32.mrb[59].mxu1  ;;  %p2112_p8 = pnand %p2111_p7, %p2105_p4 }
 0x3a2   :  { %v1616_v62 = vadd.f32 %v1615_v61, %v1614_v60  ;;  %1849 = vmatprep.mubr.f32.mxu0 %v1613_v45 }
 0x3a4   :  { %1850 = vmatmul.mubr.f32.gmra.mrb[76].mxu0 %v1616_v62 }
 0x3a6   :  { %v1617_v11 = vpop.f32.mrb[60].mxu1 }
 0x3a7   :  { %v1618_v26 = vpop.f32.mrb[61].mxu1 }
 0x3a8   :  { %v1619_v9 = vadd.f32 %v1618_v26, %v1617_v11  ;;  %v1620_v10 = vpop.f32.mrb[62].mxu1 }
 0x3a9   :  { %v1621_v13 = vpop.f32.mrb[63].mxu1 }
 0x3aa   :  { %v1622_v14 = vadd.f32 %v1621_v13, %v1620_v10  ;;  %1852 = vmatprep.mubr.f32.mxu0 %v1619_v9 }
 0x3ac   :  { %1853 = vmatmul.mubr.f32.gmra.mrb[78].mxu0 %v1622_v14 }
 0x3ae   :  { %v1623_v31 = vpop.f32.mrb[64].mxu1 }
 0x3af   :  { %v1624_v15 = vpop.f32.mrb[65].mxu1 }
 0x3b0   :  { %v1625_v8 = vadd.f32 %v1624_v15, %v1623_v31  ;;  %v1626_v19 = vpop.f32.mrb[66].mxu1 }
 0x3b1   :  { %v1627_v35 = vpop.f32.mrb[67].mxu1 }
 0x3b2   :  { %v1628_v20 = vadd.f32 %v1627_v35, %v1626_v19  ;;  %1855 = vmatprep.mubr.f32.mxu0 %v1625_v8 }
 0x3b4   :  { %1856 = vmatmul.mubr.f32.gmra.mrb[80].mxu0 %v1628_v20 }
 0x3b6   :  { %v1629_v22 = vpop.f32.mrb[68].mxu1 }
 0x3b7   :  { %v1630_v23 = vpop.f32.mrb[69].mxu1 }
 0x3b8   :  { %v1631_v24 = vadd.f32 %v1630_v23, %v1629_v22  ;;  %v1632_v43 = vpop.f32.mrb[70].mxu1 }
 0x3b9   :  { %v1633_v17 = vpop.f32.mrb[71].mxu1 }
 0x3ba   :  { %v1634_v27 = vadd.f32 %v1633_v17, %v1632_v43  ;;  %1858 = vmatprep.mubr.f32.mxu0 %v1631_v24 }
 0x3bc   :  { %1859 = vmatmul.mubr.f32.gmra.mrb[82].mxu0 %v1634_v27 }
 0x3be   :  { %v1635_v18 = vpop.f32.mrb[72].mxu1 }
 0x3bf   :  { %v1636_v21 = vpop.f32.mrb[73].mxu1 }
 0x3c0   :  { %v1637_v25 = vadd.f32 %v1636_v21, %v1635_v18  ;;  %v1638_v32 = vpop.f32.mrb[74].mxu1 }
 0x3c1   :  { %v1639_v34 = vpop.f32.mrb[75].mxu1 }
 0x3c2   :  { %v1640_v40 = vadd.f32 %v1639_v34, %v1638_v32  ;;  %1861 = vmatprep.mubr.f32.mxu0 %v1637_v25 }
 0x3c4   :  { %1862 = vmatmul.mubr.f32.gmra.mrb[84].mxu0 %v1640_v40 }
 0x3c6   :  { %v1641_v42 = vpop.f32.mrb[76].mxu1 }
 0x3c7   :  { %v1642_v46 = vpop.f32.mrb[77].mxu1 }
 0x3c8   :  { %v1643_v47 = vadd.f32 %v1642_v46, %v1641_v42  ;;  %v1644_v48 = vpop.f32.mrb[78].mxu1 }
 0x3c9   :  { %v1645_v49 = vpop.f32.mrb[79].mxu1 }
 0x3ca   :  { %v1646_v50 = vadd.f32 %v1645_v49, %v1644_v48  ;;  %1864 = vmatprep.mubr.f32.mxu0 %v1643_v47 }
 0x3cc   :  { %1865 = vmatmul.mubr.f32.gmra.mrb[86].mxu0 %v1646_v50 }
 0x3ce   :  { %v1647_v51 = vpop.f32.mrb[80].mxu1 }
 0x3cf   :  { %v1648_v52 = vpop.f32.mrb[81].mxu1 }
 0x3d0   :  { %v1649_v53 = vadd.f32 %v1648_v52, %v1647_v51  ;;  %v1650_v54 = vpop.f32.mrb[82].mxu1 }
 0x3d1   :  { %v1651_v55 = vpop.f32.mrb[83].mxu1 }
 0x3d2   :  { %v1652_v56 = vadd.f32 %v1651_v55, %v1650_v54  ;;  %1867 = vmatprep.mubr.f32.mxu0 %v1649_v53 }
 0x3d4   :  { %1868 = vmatmul.mubr.f32.gmra.mrb[88].mxu0 %v1652_v56 }
 0x3d6   :  { %v1653_v57 = vpop.f32.mrb[84].mxu1 }
 0x3d7   :  { %v1654_v58 = vpop.f32.mrb[85].mxu1 }
 0x3d8   :  { %v1655_v59 = vadd.f32 %v1654_v58, %v1653_v57  ;;  %v1656_v63 = vpop.f32.mrb[86].mxu1 }
 0x3d9   :  { %v1657_v0 = vpop.f32.mrb[87].mxu1 }
 0x3da   :  { %v1658_v1 = vadd.f32 %v1657_v0, %v1656_v63  ;;  %1870 = vmatprep.mubr.f32.mxu0 %v1655_v59 }
 0x3dc   :  { %1871 = vmatmul.mubr.f32.gmra.mrb[90].mxu0 %v1658_v1 }
 0x3de   :  { %v1659_v2 = vpop.f32.mrb[88].mxu1 }
 0x3df   :  { %v1660_v3 = vpop.f32.mrb[89].mxu1 }
 0x3e0   :  { %v1661_v4 = vadd.f32 %v1660_v3, %v1659_v2  ;;  %v1662_v5 = vpop.f32.mrb[90].mxu1 }
 0x3e1   :  { %v1663_v6 = vpop.f32.mrb[91].mxu1 }
 0x3e2   :  { %v1664_v7 = vadd.f32 %v1663_v6, %v1662_v5  ;;  %1873 = vmatprep.mubr.f32.mxu0 %v1661_v4 }
 0x3e4   :  { %1874 = vmatmul.mubr.f32.gmra.mrb[92].mxu0 %v1664_v7 }
 0x3e6   :  { %v1665_v28 = vpop.f32.mrb[92].mxu1 }
 0x3e7   :  { %v1666_v44 = vpop.f32.mrb[93].mxu1 }
 0x3e8   :  { %v1667_v29 = vadd.f32 %v1666_v44, %v1665_v28  ;;  %v1668_v30 = vpop.f32.mrb[94].mxu1 }
 0x3e9   :  { %v1669_v33 = vpop.f32.mrb[95].mxu1 }
 0x3ea   :  { %v1670_v36 = vadd.f32 %v1669_v33, %v1668_v30  ;;  %1876 = vmatprep.mubr.f32.mxu0 %v1667_v29 }
 0x3ec   :  { %1877 = vmatmul.mubr.f32.gmra.mrb[94].mxu0 %v1670_v36 }
 0x447   :  { %v1833_v38 = vpop.f32.mrb[64].mxu0 }
 0x448   :  { %v1145_v12 = vadd.f32 %v1833_v38, %v2428_v37  ;;  %v1139_v16 = vpop.f32.mrb[65].mxu0 }
 0x449   :  { %v1140_v39 = vadd.f32 %v2428_v37, %v1139_v16 }
 0x44a   :  { %1299 = vst [vmem:[#allocation11 + $0x8] sm:$0xff] %v1145_v12 }
 0x44b   :  { %1298 = vst [vmem:[#allocation11] sm:$0xff] %v1140_v39 }
 0x44f   :  { %v1836_v41 = vpop.f32.mrb[66].mxu0 }
 0x450   :  { %v1155_v45 = vadd.f32 %v1836_v41, %v2428_v37  ;;  %v1149_v60 = vpop.f32.mrb[67].mxu0 }
 0x451   :  { %v1150_v61 = vadd.f32 %v2428_v37, %v1149_v60 }
 0x452   :  { %1301 = vst [vmem:[#allocation11 + $0x18] sm:$0xff] %v1155_v45 }
 0x453   :  { %1300 = vst [vmem:[#allocation11 + $0x10] sm:$0xff] %v1150_v61 }
 0x457   :  { %v1839_v62 = vpop.f32.mrb[68].mxu0 }
 0x458   :  { %v1165_v11 = vadd.f32 %v1839_v62, %v2428_v37  ;;  %v1159_v26 = vpop.f32.mrb[69].mxu0 }
 0x459   :  { %v1160_v9 = vadd.f32 %v2428_v37, %v1159_v26 }
 0x45a   :  { %1303 = vst [vmem:[#allocation11 + $0x28] sm:$0xff] %v1165_v11 }
 0x45b   :  { %1302 = vst [vmem:[#allocation11 + $0x20] sm:$0xff] %v1160_v9 }
 0x45f   :  { %v1842_v10 = vpop.f32.mrb[70].mxu0 }
 0x460   :  { %v1175_v13 = vadd.f32 %v1842_v10, %v2428_v37  ;;  %v1169_v14 = vpop.f32.mrb[71].mxu0 }
 0x461   :  { %v1170_v31 = vadd.f32 %v2428_v37, %v1169_v14 }
 0x462   :  { %1305 = vst [vmem:[#allocation11 + $0x38] sm:$0xff] %v1175_v13 }
 0x463   :  { %1304 = vst [vmem:[#allocation11 + $0x30] sm:$0xff] %v1170_v31 }
 0x467   :  { %v1845_v15 = vpop.f32.mrb[72].mxu0 }
 0x468   :  { %v1185_v8 = vadd.f32 %v1845_v15, %v2428_v37  ;;  %v1179_v19 = vpop.f32.mrb[73].mxu0 }
 0x469   :  { %v1180_v35 = vadd.f32 %v2428_v37, %v1179_v19 }
 0x46a   :  { %1307 = vst [vmem:[#allocation11 + $0x48] sm:$0xff] %v1185_v8 }
 0x46b   :  { %1306 = vst [vmem:[#allocation11 + $0x40] sm:$0xff] %v1180_v35 }
 0x46f   :  { %v1848_v20 = vpop.f32.mrb[74].mxu0 }
 0x470   :  { %v1195_v22 = vadd.f32 %v1848_v20, %v2428_v37  ;;  %v1189_v23 = vpop.f32.mrb[75].mxu0 }
 0x471   :  { %v1190_v24 = vadd.f32 %v2428_v37, %v1189_v23 }
 0x472   :  { %1309 = vst [vmem:[#allocation11 + $0x58] sm:$0xff] %v1195_v22 }
 0x473   :  { %1308 = vst [vmem:[#allocation11 + $0x50] sm:$0xff] %v1190_v24 }
 0x477   :  { %v1851_v43 = vpop.f32.mrb[76].mxu0 }
 0x478   :  { %v1205_v17 = vadd.f32 %v1851_v43, %v2428_v37  ;;  %v1199_v27 = vpop.f32.mrb[77].mxu0 }
 0x479   :  { %v1200_v18 = vadd.f32 %v2428_v37, %v1199_v27 }
 0x47a   :  { %1311 = vst [vmem:[#allocation11 + $0x68] sm:$0xff] %v1205_v17 }
 0x47b   :  { %1310 = vst [vmem:[#allocation11 + $0x60] sm:$0xff] %v1200_v18 }
 0x47f   :  { %v1854_v21 = vpop.f32.mrb[78].mxu0 }
 0x480   :  { %v1215_v25 = vadd.f32 %v1854_v21, %v2428_v37  ;;  %v1209_v32 = vpop.f32.mrb[79].mxu0 }
 0x481   :  { %v1210_v34 = vadd.f32 %v2428_v37, %v1209_v32 }
 0x482   :  { %1313 = vst [vmem:[#allocation11 + $0x78] sm:$0xff] %v1215_v25 }
 0x483   :  { %1312 = vst [vmem:[#allocation11 + $0x70] sm:$0xff] %v1210_v34 }
 0x487   :  { %v1857_v40 = vpop.f32.mrb[80].mxu0 }
 0x488   :  { %v1225_v42 = vadd.f32 %v1857_v40, %v2428_v37  ;;  %v1219_v46 = vpop.f32.mrb[81].mxu0 }
 0x489   :  { %v1220_v47 = vadd.f32 %v2428_v37, %v1219_v46 }
 0x48a   :  { %1315 = vst [vmem:[#allocation11 + $0x88] sm:$0xff] %v1225_v42 }
 0x48b   :  { %1314 = vst [vmem:[#allocation11 + $0x80] sm:$0xff] %v1220_v47 }
 0x48f   :  { %v1860_v48 = vpop.f32.mrb[82].mxu0 }
 0x490   :  { %v1235_v49 = vadd.f32 %v1860_v48, %v2428_v37  ;;  %v1229_v50 = vpop.f32.mrb[83].mxu0 }
 0x491   :  { %v1230_v51 = vadd.f32 %v2428_v37, %v1229_v50 }
 0x492   :  { %1317 = vst [vmem:[#allocation11 + $0x98] sm:$0xff] %v1235_v49 }
 0x493   :  { %1316 = vst [vmem:[#allocation11 + $0x90] sm:$0xff] %v1230_v51 }
 0x497   :  { %v1863_v52 = vpop.f32.mrb[84].mxu0 }
 0x498   :  { %v1245_v53 = vadd.f32 %v1863_v52, %v2428_v37  ;;  %v1239_v54 = vpop.f32.mrb[85].mxu0 }
 0x499   :  { %v1240_v55 = vadd.f32 %v2428_v37, %v1239_v54 }
 0x49a   :  { %1319 = vst [vmem:[#allocation11 + $0xa8] sm:$0xff] %v1245_v53 }
 0x49b   :  { %1318 = vst [vmem:[#allocation11 + $0xa0] sm:$0xff] %v1240_v55 }
 0x49f   :  { %v1866_v56 = vpop.f32.mrb[86].mxu0 }
 0x4a0   :  { %v1255_v57 = vadd.f32 %v1866_v56, %v2428_v37  ;;  %v1249_v58 = vpop.f32.mrb[87].mxu0 }
 0x4a1   :  { %v1250_v59 = vadd.f32 %v2428_v37, %v1249_v58 }
 0x4a2   :  { %1321 = vst [vmem:[#allocation11 + $0xb8] sm:$0xff] %v1255_v57 }
 0x4a3   :  { %1320 = vst [vmem:[#allocation11 + $0xb0] sm:$0xff] %v1250_v59 }
 0x4a7   :  { %v1869_v63 = vpop.f32.mrb[88].mxu0 }
 0x4a8   :  { %v1265_v0 = vadd.f32 %v1869_v63, %v2428_v37  ;;  %v1259_v1 = vpop.f32.mrb[89].mxu0 }
 0x4a9   :  { %v1260_v2 = vadd.f32 %v2428_v37, %v1259_v1 }
 0x4aa   :  { %1323 = vst [vmem:[#allocation11 + $0xc8] sm:$0xff] %v1265_v0 }
 0x4ab   :  { %1322 = vst [vmem:[#allocation11 + $0xc0] sm:$0xff] %v1260_v2 }
 0x4af   :  { %v1872_v3 = vpop.f32.mrb[90].mxu0 }
 0x4b0   :  { %v1275_v4 = vadd.f32 %v1872_v3, %v2428_v37  ;;  %v1269_v5 = vpop.f32.mrb[91].mxu0 }
 0x4b1   :  { %v1270_v6 = vadd.f32 %v2428_v37, %v1269_v5 }
 0x4b2   :  { %1325 = vst [vmem:[#allocation11 + $0xd8] sm:$0xff] %v1275_v4 }
 0x4b3   :  { %1324 = vst [vmem:[#allocation11 + $0xd0] sm:$0xff] %v1270_v6 }
 0x4b7   :  { %v1875_v7 = vpop.f32.mrb[92].mxu0 }
 0x4b8   :  { %v1285_v28 = vadd.f32 %v1875_v7, %v2428_v37  ;;  %v1279_v44 = vpop.f32.mrb[93].mxu0 }
 0x4b9   :  { %v1280_v29 = vadd.f32 %v2428_v37, %v1279_v44 }
 0x4ba   :  { %1327 = vst [vmem:[#allocation11 + $0xe8] sm:$0xff] %v1285_v28 }
 0x4bb   :  { %1326 = vst [vmem:[#allocation11 + $0xe0] sm:$0xff] %v1280_v29 }
 0x4bf   :  { %v1878_v30 = vpop.f32.mrb[94].mxu0 }
 0x4c0   :  { %v1295_v33 = vadd.f32 %v1878_v30, %v2428_v37  ;;  %v1289_v36 = vpop.f32.mrb[95].mxu0 }
 0x4c1   :  { %v1290_v38 = vadd.f32 %v2428_v37, %v1289_v36 }
 0x4c2   :  { %1329 = vst [vmem:[#allocation11 + $0xf8] sm:$0xff] %v1295_v33 }
 0x4c3   :  { %1328 = vst [vmem:[#allocation11 + $0xf0] sm:$0xff] %v1290_v38 }
 0x4c4   :  { %2115 = shalt.err (!%p2112_p8)
}
 0x4c5   :  { %s2116_s29 = scalar_lea.hbm %s2483_s6, 4096 }
 0x4c6   :  { %p2117_p9 = scmp.ne.s32.totalorder %s2483_s6, %s2116_s29  ;;  %p2120_p10 = scmp.lt.u32.totalorder %s2116_s29, %s2483_s6 }
 0x4c8   :  { %p2122_p11 = pnand %p2120_p10, %p2117_p9 }
 0x4ca   :  { %2125 = shalt.err (!%p2122_p11)
}
 0x4cb   :  { %1341 = dma.vmem_to_hbm [thread:$0]  %s1336_s25, 4096, %s2483_s6, [#allocation5], %s2138_s1, %s2138_s1, %s2139_s21  }
 0x4cc   :  { %2132 = dma.done.wait [#allocation5], 4096  }
 0x4cd   :  { %2133 = vsyncadd [#allocation5], 4294963200 }
 0x4ce   :  { %1345 = vsyncpa [#allocation4], 1 }
 0x4cf   :  { %1346 = vsyncpa [#allocation7], 1 }
 0x4d0   :  { %1347 = vsyncpa [#allocation10], 1 }
 0x4d1   :  { %1348 = vsyncpa [#allocation5], 1 }

</bundles_post_ra>
